<compile_context>
chip_gen: v6e
topology: v6e:2x2x1
jax: 0.10.0
libtpu: 0.0.40
codegen_flags: <defaults>
</compile_context>

<pallas_src>
import jax
import jax.numpy as jnp
from jax import lax
from jax.experimental import pallas as pl
from jax.experimental.pallas import tpu as pltpu

EPS = 1e-5


def double_conv_forward(x_nchw, kparams):
    """Pallas implementation of double_conv.forward; input/output are NCHW."""
    w1, s1, b1, w2, s2, b2 = kparams          # w* are bf16 (Cout, 9*Cin_layer)
    N, Cin, H, W = x_nchw.shape
    Cout = w1.shape[0]

    hp2, wp2 = H + 2, W + 2                   # zero-padded (padding=1) grid
    S = hp2 * wp2                             # flattened padded-grid size
    G = wp2 + 1                               # lane guard: max |tap offset|
    St = S + 2 * G                            # guarded slab width

    # --- wrapper-side layout plumbing (pre-padding, no transposes) ----------
    xp = jnp.pad(x_nchw, ((0, 0), (0, 0), (1, 1), (1, 1)))          # (N,C,H+2,W+2)
    xflat = xp.reshape(N, Cin, S)
    xflat = jnp.pad(xflat, ((0, 0), (0, 0), (G, G)))                # (N,C,St) f32

    # interior mask: 1.0 at real pixels, 0.0 on the padding ring of the grid
    row = jnp.arange(hp2)[:, None]
    col = jnp.arange(wp2)[None, :]
    interior = (row >= 1) & (row <= H) & (col >= 1) & (col <= W)
    mask = interior.astype(jnp.float32).reshape(1, S)

    # static tap offsets in the flattened padded grid (kh outer, kw inner,
    # matching the (kh, kw, cin) ordering of the folded weights)
    taps = [(kh - 1) * wp2 + (kw - 1) for kh in range(3) for kw in range(3)]

    def kernel(x_ref, mask_ref, w1_ref, s1_ref, b1_ref,
               w2_ref, s2_ref, b2_ref, out_ref, y1_ext):
        # x_ref   : (Cin, St) f32  guarded, zero-padded, flattened image
        # mask_ref: (1, S)    f32  interior mask
        # w*_ref  : (Cout, 9*Cin_layer) bf16
        # s*/b*   : (Cout, 1) f32  folded BN scale / shift (conv bias included)
        # out_ref : (Cout, S) f32  conv2 output on the padded grid
        # y1_ext  : (Cout, St) f32 VMEM scratch (guarded conv1 output)
        m = mask_ref[...]

        # ---- conv1: single fused im2col matmul, K = 9*Cin ------------------
        x = x_ref[...]
        patch1 = jnp.concatenate(
            [x[:, G + d: G + d + S] for d in taps], axis=0)          # (9*Cin, S)
        acc1 = jnp.dot(w1_ref[...], patch1.astype(jnp.bfloat16),
                       preferred_element_type=jnp.float32)           # (Cout, S)
        y1 = jnp.maximum(acc1 * s1_ref[...] + b1_ref[...], 0.0)
        y1 = y1 * m                       # zero the ring -> conv2 zero padding

        # ---- stage conv1 result in a guarded VMEM scratch (no concat pad) --
        y1_ext[:, :G] = jnp.zeros((Cout, G), jnp.float32)
        y1_ext[:, G + S:] = jnp.zeros((Cout, G), jnp.float32)
        y1_ext[:, G:G + S] = y1

        # ---- conv2: single fused im2col matmul, K = 9*Cout ------------------
        patch2 = jnp.concatenate(
            [y1_ext[:, G + d: G + d + S] for d in taps], axis=0)     # (9*Cout, S)
        acc2 = jnp.dot(w2_ref[...], patch2.astype(jnp.bfloat16),
                       preferred_element_type=jnp.float32)           # (Cout, S)
        out_ref[...] = acc2 * s2_ref[...] + b2_ref[...]              # no ReLU

    flops = 2 * N * S * 9 * Cin * Cout + 2 * N * S * 9 * Cout * Cout
    bytes_accessed = (N * Cin * St * 4 + S * 4
                      + Cout * 9 * Cin * 2 + Cout * 9 * Cout * 2
                      + 4 * Cout * 4
                      + N * Cout * S * 4)

    out_pad = pl.pallas_call(
        kernel,
        out_shape=jax.ShapeDtypeStruct((N, Cout, S), jnp.float32),
        grid=(N,),
        in_specs=[
            pl.BlockSpec((None, Cin, St), lambda n: (n, 0, 0)),
            pl.BlockSpec((1, S), lambda n: (0, 0)),
            pl.BlockSpec((Cout, 9 * Cin), lambda n: (0, 0)),
            pl.BlockSpec((Cout, 1), lambda n: (0, 0)),
            pl.BlockSpec((Cout, 1), lambda n: (0, 0)),
            pl.BlockSpec((Cout, 9 * Cout), lambda n: (0, 0)),
            pl.BlockSpec((Cout, 1), lambda n: (0, 0)),
            pl.BlockSpec((Cout, 1), lambda n: (0, 0)),
        ],
        out_specs=pl.BlockSpec((None, Cout, S), lambda n: (n, 0, 0)),
        scratch_shapes=[pltpu.VMEM((Cout, St), jnp.float32)],
        compiler_params=pltpu.CompilerParams(
            dimension_semantics=("parallel",),
            vmem_limit_bytes=32 * 1024 * 1024),
        cost_estimate=pl.CostEstimate(flops=flops, transcendentals=0,
                                      bytes_accessed=bytes_accessed),
    )(xflat, mask, w1, s1, b1, w2, s2, b2)

    # drop the padding ring (layout plumbing only; store stayed lane-dense)
    out = out_pad.reshape(N, Cout, hp2, wp2)[:, :, 1:1 + H, 1:1 + W]
    return out


# ----------------------- parameter setup (deterministic) --------------------
def init_params(key, in_ch, out_ch):
    ks = jax.random.split(key, 12)

    def conv_w(k, cin, cout):
        bound = 1.0 / ((cin * 9) ** 0.5)
        return jax.random.uniform(k, (cout, cin, 3, 3), jnp.float32, -bound, bound)

    w1 = conv_w(ks[0], in_ch, out_ch)
    b1 = jax.random.uniform(ks[1], (out_ch,), jnp.float32, -0.3, 0.3)
    g1 = 1.0 + 0.1 * jax.random.normal(ks[2], (out_ch,), jnp.float32)
    be1 = 0.1 * jax.random.normal(ks[3], (out_ch,), jnp.float32)
    m1 = 0.1 * jax.random.normal(ks[4], (out_ch,), jnp.float32)
    v1 = jnp.abs(1.0 + 0.1 * jax.random.normal(ks[5], (out_ch,), jnp.float32))

    w2 = conv_w(ks[6], out_ch, out_ch)
    b2 = jax.random.uniform(ks[7], (out_ch,), jnp.float32, -0.3, 0.3)
    g2 = 1.0 + 0.1 * jax.random.normal(ks[8], (out_ch,), jnp.float32)
    be2 = 0.1 * jax.random.normal(ks[9], (out_ch,), jnp.float32)
    m2 = 0.1 * jax.random.normal(ks[10], (out_ch,), jnp.float32)
    v2 = jnp.abs(1.0 + 0.1 * jax.random.normal(ks[11], (out_ch,), jnp.float32))

    raw = (w1, b1, g1, be1, m1, v1, w2, b2, g2, be2, m2, v2)

    def fold(w_oihw, b, g, be, m, v):
        cout, cin = w_oihw.shape[0], w_oihw.shape[1]
        # OIHW -> (O, KH, KW, I) -> (O, 9*I);  K index = (kh*3 + kw)*Cin + cin
        w_k = jnp.transpose(w_oihw, (0, 2, 3, 1)).reshape(cout, 9 * cin)
        scale = g / jnp.sqrt(v + EPS)
        shift = be + scale * (b - m)
        return (w_k.astype(jnp.bfloat16),
                scale.reshape(cout, 1).astype(jnp.float32),
                shift.reshape(cout, 1).astype(jnp.float32))

    w1_k, s1, sh1 = fold(w1, b1, g1, be1, m1, v1)
    w2_k, s2, sh2 = fold(w2, b2, g2, be2, m2, v2)
    kparams = (w1_k, s1, sh1, w2_k, s2, sh2)
    return raw, kparams


# ------------------------------- reference ----------------------------------
def ref_forward(x, raw):
    (w1, b1, g1, be1, m1, v1, w2, b2, g2, be2, m2, v2) = raw

    def conv_bn(y, w, b, g, be, m, v, relu):
        z = lax.conv_general_dilated(
            y, w, (1, 1), ((1, 1), (1, 1)),
            dimension_numbers=("NCHW", "OIHW", "NCHW"),
            precision=lax.Precision.HIGHEST)
        z = z + b[None, :, None, None]
        z = (z - m[None, :, None, None]) / jnp.sqrt(v[None, :, None, None] + EPS)
        z = z * g[None, :, None, None] + be[None, :, None, None]
        if relu:
            z = jnp.maximum(z, 0.0)
        return z

    y = conv_bn(x, w1, b1, g1, be1, m1, v1, True)
    y = conv_bn(y, w2, b2, g2, be2, m2, v2, False)
    return y


if __name__ == "__main__":
    N, Cin, H, W = 2, 4, 16, 16
    Cout = 8

    key = jax.random.PRNGKey(0)
    kx, kp = jax.random.split(key)
    x = jax.random.normal(kx, (N, Cin, H, W), jnp.float32)
    raw, kparams = init_params(kp, Cin, Cout)

    out = jax.block_until_ready(double_conv_forward(x, kparams))
    ref = jax.block_until_ready(ref_forward(x, raw))

    assert out.shape == (N, Cout, H, W)
    # bf16 MXU operands (f32 accumulation) vs f32 HIGHEST reference -> loosened
    # tolerance; observed error is ~1e-2 worst case at these magnitudes.
    assert jnp.allclose(out, ref, atol=5e-2, rtol=5e-2), \
        float(jnp.max(jnp.abs(out - ref)))

    print("KERNEL_OK")
</pallas_src>

<mosaic_0001>
module attributes {stable_mosaic.version = 11 : i64} {
  func.func @kernel(%arg0: i32, %arg1: memref<1x4x362xf32, #tpu.memory_space<vmem>>, %arg2: memref<1x324xf32, #tpu.memory_space<vmem>>, %arg3: memref<8x36xbf16, #tpu.memory_space<vmem>>, %arg4: memref<8x1xf32, #tpu.memory_space<vmem>>, %arg5: memref<8x1xf32, #tpu.memory_space<vmem>>, %arg6: memref<8x72xbf16, #tpu.memory_space<vmem>>, %arg7: memref<8x1xf32, #tpu.memory_space<vmem>>, %arg8: memref<8x1xf32, #tpu.memory_space<vmem>>, %arg9: memref<1x8x324xf32, #tpu.memory_space<vmem>>, %arg10: memref<8x362xf32, #tpu.memory_space<vmem>>) attributes {dimension_semantics = [#tpu.dimension_semantics<parallel>], iteration_bounds = array<i64: 2>, scalar_prefetch = 0 : i64, scratch_operands = 1 : i64, tpu.core_type = #tpu.core_type<tc>, window_params = [{transform_indices = @transform_0, window_bounds = array<i64: 1, 4, 362>}, {pipeline_mode = #tpu.pipeline_mode<synchronous>, transform_indices = @transform_1, window_bounds = array<i64: 1, 324>}, {pipeline_mode = #tpu.pipeline_mode<synchronous>, transform_indices = @transform_2, window_bounds = array<i64: 8, 36>}, {pipeline_mode = #tpu.pipeline_mode<synchronous>, transform_indices = @transform_3, window_bounds = array<i64: 8, 1>}, {pipeline_mode = #tpu.pipeline_mode<synchronous>, transform_indices = @transform_4, window_bounds = array<i64: 8, 1>}, {pipeline_mode = #tpu.pipeline_mode<synchronous>, transform_indices = @transform_5, window_bounds = array<i64: 8, 72>}, {pipeline_mode = #tpu.pipeline_mode<synchronous>, transform_indices = @transform_6, window_bounds = array<i64: 8, 1>}, {pipeline_mode = #tpu.pipeline_mode<synchronous>, transform_indices = @transform_7, window_bounds = array<i64: 8, 1>}, {transform_indices = @transform_8, window_bounds = array<i64: 1, 8, 324>}]} {
    %c0 = arith.constant 0 : index
    %c0_0 = arith.constant 0 : index
    %0 = vector.load %arg2[%c0, %c0_0] : memref<1x324xf32, #tpu.memory_space<vmem>>, vector<1x324xf32>
    %c0_1 = arith.constant 0 : index
    %c0_2 = arith.constant 0 : index
    %c0_3 = arith.constant 0 : index
    %1 = vector.load %arg1[%c0_1, %c0_2, %c0_3] : memref<1x4x362xf32, #tpu.memory_space<vmem>>, vector<1x4x362xf32>
    %2 = vector.shape_cast %1 : vector<1x4x362xf32> to vector<4x362xf32>
    %3 = vector.extract_strided_slice %2 {offsets = [0, 0], sizes = [4, 324], strides = [1, 1]} : vector<4x362xf32> to vector<4x324xf32>
    %4 = vector.extract_strided_slice %2 {offsets = [0, 1], sizes = [4, 324], strides = [1, 1]} : vector<4x362xf32> to vector<4x324xf32>
    %5 = vector.extract_strided_slice %2 {offsets = [0, 2], sizes = [4, 324], strides = [1, 1]} : vector<4x362xf32> to vector<4x324xf32>
    %6 = vector.extract_strided_slice %2 {offsets = [0, 18], sizes = [4, 324], strides = [1, 1]} : vector<4x362xf32> to vector<4x324xf32>
    %7 = vector.extract_strided_slice %2 {offsets = [0, 19], sizes = [4, 324], strides = [1, 1]} : vector<4x362xf32> to vector<4x324xf32>
    %8 = vector.extract_strided_slice %2 {offsets = [0, 20], sizes = [4, 324], strides = [1, 1]} : vector<4x362xf32> to vector<4x324xf32>
    %9 = vector.extract_strided_slice %2 {offsets = [0, 36], sizes = [4, 324], strides = [1, 1]} : vector<4x362xf32> to vector<4x324xf32>
    %10 = vector.extract_strided_slice %2 {offsets = [0, 37], sizes = [4, 324], strides = [1, 1]} : vector<4x362xf32> to vector<4x324xf32>
    %11 = vector.extract_strided_slice %2 {offsets = [0, 38], sizes = [4, 324], strides = [1, 1]} : vector<4x362xf32> to vector<4x324xf32>
    %12 = tpu.concatenate %3, %4, %5, %6, %7, %8, %9, %10, %11 in 0 : vector<4x324xf32>, vector<4x324xf32>, vector<4x324xf32>, vector<4x324xf32>, vector<4x324xf32>, vector<4x324xf32>, vector<4x324xf32>, vector<4x324xf32>, vector<4x324xf32> -> vector<36x324xf32>
    %c0_4 = arith.constant 0 : index
    %c0_5 = arith.constant 0 : index
    %13 = vector.load %arg3[%c0_4, %c0_5] : memref<8x36xbf16, #tpu.memory_space<vmem>>, vector<8x36xbf16>
    %14 = arith.truncf %12 : vector<36x324xf32> to vector<36x324xbf16>
    %cst = arith.constant dense<0.000000e+00> : vector<8x324xf32>
    %15 = tpu.matmul %13, %14, %cst {dimension_numbers = #tpu.dot_dimension_numbers<[1], [0], [0], [1], [0, 0, 1, 1], [], []>} : vector<8x36xbf16>, vector<36x324xbf16>, vector<8x324xf32> -> vector<8x324xf32>
    %c0_6 = arith.constant 0 : index
    %c0_7 = arith.constant 0 : index
    %16 = vector.load %arg4[%c0_6, %c0_7] : memref<8x1xf32, #tpu.memory_space<vmem>>, vector<8x1xf32>
    %17 = vector.broadcast %16 : vector<8x1xf32> to vector<8x324xf32>
    %18 = arith.mulf %15, %17 : vector<8x324xf32>
    %c0_8 = arith.constant 0 : index
    %c0_9 = arith.constant 0 : index
    %19 = vector.load %arg5[%c0_8, %c0_9] : memref<8x1xf32, #tpu.memory_space<vmem>>, vector<8x1xf32>
    %20 = vector.broadcast %19 : vector<8x1xf32> to vector<8x324xf32>
    %21 = arith.addf %18, %20 : vector<8x324xf32>
    %cst_10 = arith.constant 0.000000e+00 : f32
    %22 = vector.broadcast %cst_10 : f32 to vector<8x324xf32>
    %23 = arith.maximumf %21, %22 : vector<8x324xf32>
    %24 = vector.broadcast %0 : vector<1x324xf32> to vector<8x324xf32>
    %25 = arith.mulf %23, %24 : vector<8x324xf32>
    %cst_11 = arith.constant 0.000000e+00 : f32
    %26 = vector.broadcast %cst_11 : f32 to vector<8x19xf32>
    %c0_12 = arith.constant 0 : index
    %c0_13 = arith.constant 0 : index
    %27 = vector.load %arg10[%c0_12, %c0_13] : memref<8x362xf32, #tpu.memory_space<vmem>>, vector<8x19xf32>
    tpu.vector_store %arg10[%c0_12, %c0_13], %26 {strides = array<i32>} : memref<8x362xf32, #tpu.memory_space<vmem>>, vector<8x19xf32>,
    %cst_14 = arith.constant 0.000000e+00 : f32
    %28 = vector.broadcast %cst_14 : f32 to vector<8x19xf32>
    %c0_15 = arith.constant 0 : index
    %c343 = arith.constant 343 : index
    %29 = vector.load %arg10[%c0_15, %c343] : memref<8x362xf32, #tpu.memory_space<vmem>>, vector<8x19xf32>
    tpu.vector_store %arg10[%c0_15, %c343], %28 {strides = array<i32>} : memref<8x362xf32, #tpu.memory_space<vmem>>, vector<8x19xf32>,
    %c0_16 = arith.constant 0 : index
    %c19 = arith.constant 19 : index
    %30 = vector.load %arg10[%c0_16, %c19] : memref<8x362xf32, #tpu.memory_space<vmem>>, vector<8x324xf32>
    tpu.vector_store %arg10[%c0_16, %c19], %25 {strides = array<i32>} : memref<8x362xf32, #tpu.memory_space<vmem>>, vector<8x324xf32>,
    %c0_17 = arith.constant 0 : index
    %c0_18 = arith.constant 0 : index
    %31 = vector.load %arg10[%c0_17, %c0_18] : memref<8x362xf32, #tpu.memory_space<vmem>>, vector<8x324xf32>
    %c0_19 = arith.constant 0 : index
    %c1 = arith.constant 1 : index
    %32 = vector.load %arg10[%c0_19, %c1] : memref<8x362xf32, #tpu.memory_space<vmem>>, vector<8x324xf32>
    %c0_20 = arith.constant 0 : index
    %c2 = arith.constant 2 : index
    %33 = vector.load %arg10[%c0_20, %c2] : memref<8x362xf32, #tpu.memory_space<vmem>>, vector<8x324xf32>
    %c0_21 = arith.constant 0 : index
    %c18 = arith.constant 18 : index
    %34 = vector.load %arg10[%c0_21, %c18] : memref<8x362xf32, #tpu.memory_space<vmem>>, vector<8x324xf32>
    %c0_22 = arith.constant 0 : index
    %c19_23 = arith.constant 19 : index
    %35 = vector.load %arg10[%c0_22, %c19_23] : memref<8x362xf32, #tpu.memory_space<vmem>>, vector<8x324xf32>
    %c0_24 = arith.constant 0 : index
    %c20 = arith.constant 20 : index
    %36 = vector.load %arg10[%c0_24, %c20] : memref<8x362xf32, #tpu.memory_space<vmem>>, vector<8x324xf32>
    %c0_25 = arith.constant 0 : index
    %c36 = arith.constant 36 : index
    %37 = vector.load %arg10[%c0_25, %c36] : memref<8x362xf32, #tpu.memory_space<vmem>>, vector<8x324xf32>
    %c0_26 = arith.constant 0 : index
    %c37 = arith.constant 37 : index
    %38 = vector.load %arg10[%c0_26, %c37] : memref<8x362xf32, #tpu.memory_space<vmem>>, vector<8x324xf32>
    %c0_27 = arith.constant 0 : index
    %c38 = arith.constant 38 : index
    %39 = vector.load %arg10[%c0_27, %c38] : memref<8x362xf32, #tpu.memory_space<vmem>>, vector<8x324xf32>
    %40 = tpu.concatenate %31, %32, %33, %34, %35, %36, %37, %38, %39 in 0 : vector<8x324xf32>, vector<8x324xf32>, vector<8x324xf32>, vector<8x324xf32>, vector<8x324xf32>, vector<8x324xf32>, vector<8x324xf32>, vector<8x324xf32>, vector<8x324xf32> -> vector<72x324xf32>
    %c0_28 = arith.constant 0 : index
    %c0_29 = arith.constant 0 : index
    %41 = vector.load %arg6[%c0_28, %c0_29] : memref<8x72xbf16, #tpu.memory_space<vmem>>, vector<8x72xbf16>
    %42 = arith.truncf %40 : vector<72x324xf32> to vector<72x324xbf16>
    %cst_30 = arith.constant dense<0.000000e+00> : vector<8x324xf32>
    %43 = tpu.matmul %41, %42, %cst_30 {dimension_numbers = #tpu.dot_dimension_numbers<[1], [0], [0], [1], [0, 0, 1, 1], [], []>} : vector<8x72xbf16>, vector<72x324xbf16>, vector<8x324xf32> -> vector<8x324xf32>
    %c0_31 = arith.constant 0 : index
    %c0_32 = arith.constant 0 : index
    %44 = vector.load %arg7[%c0_31, %c0_32] : memref<8x1xf32, #tpu.memory_space<vmem>>, vector<8x1xf32>
    %45 = vector.broadcast %44 : vector<8x1xf32> to vector<8x324xf32>
    %46 = arith.mulf %43, %45 : vector<8x324xf32>
    %c0_33 = arith.constant 0 : index
    %c0_34 = arith.constant 0 : index
    %47 = vector.load %arg8[%c0_33, %c0_34] : memref<8x1xf32, #tpu.memory_space<vmem>>, vector<8x1xf32>
    %48 = vector.broadcast %47 : vector<8x1xf32> to vector<8x324xf32>
    %49 = arith.addf %46, %48 : vector<8x324xf32>
    %c0_35 = arith.constant 0 : index
    %c0_36 = arith.constant 0 : index
    %c0_37 = arith.constant 0 : index
    %50 = vector.load %arg9[%c0_35, %c0_36, %c0_37] : memref<1x8x324xf32, #tpu.memory_space<vmem>>, vector<1x8x324xf32>
    %51 = vector.shape_cast %50 : vector<1x8x324xf32> to vector<8x324xf32>
    %52 = vector.shape_cast %49 : vector<8x324xf32> to vector<1x8x324xf32>
    tpu.vector_store %arg9[%c0_35, %c0_36, %c0_37], %52 {strides = array<i32>} : memref<1x8x324xf32, #tpu.memory_space<vmem>>, vector<1x8x324xf32>,
    return
  }
  func.func @transform_0(%arg0: i32) -> (i32, i32, i32) {
    %c0_i32 = arith.constant 0 : i32
    %c0_i32_0 = arith.constant 0 : i32
    %c0_i32_1 = arith.constant 0 : i32
    return %arg0, %c0_i32, %c0_i32_0 : i32, i32, i32
  }
  func.func @transform_1(%arg0: i32) -> (i32, i32) {
    %c0_i32 = arith.constant 0 : i32
    %c0_i32_0 = arith.constant 0 : i32
    %c0_i32_1 = arith.constant 0 : i32
    return %c0_i32, %c0_i32_0 : i32, i32
  }
  func.func @transform_2(%arg0: i32) -> (i32, i32) {
    %c0_i32 = arith.constant 0 : i32
    %c0_i32_0 = arith.constant 0 : i32
    %c0_i32_1 = arith.constant 0 : i32
    return %c0_i32, %c0_i32_0 : i32, i32
  }
  func.func @transform_3(%arg0: i32) -> (i32, i32) {
    %c0_i32 = arith.constant 0 : i32
    %c0_i32_0 = arith.constant 0 : i32
    %c0_i32_1 = arith.constant 0 : i32
    return %c0_i32, %c0_i32_0 : i32, i32
  }
  func.func @transform_4(%arg0: i32) -> (i32, i32) {
    %c0_i32 = arith.constant 0 : i32
    %c0_i32_0 = arith.constant 0 : i32
    %c0_i32_1 = arith.constant 0 : i32
    return %c0_i32, %c0_i32_0 : i32, i32
  }
  func.func @transform_5(%arg0: i32) -> (i32, i32) {
    %c0_i32 = arith.constant 0 : i32
    %c0_i32_0 = arith.constant 0 : i32
    %c0_i32_1 = arith.constant 0 : i32
    return %c0_i32, %c0_i32_0 : i32, i32
  }
  func.func @transform_6(%arg0: i32) -> (i32, i32) {
    %c0_i32 = arith.constant 0 : i32
    %c0_i32_0 = arith.constant 0 : i32
    %c0_i32_1 = arith.constant 0 : i32
    return %c0_i32, %c0_i32_0 : i32, i32
  }
  func.func @transform_7(%arg0: i32) -> (i32, i32) {
    %c0_i32 = arith.constant 0 : i32
    %c0_i32_0 = arith.constant 0 : i32
    %c0_i32_1 = arith.constant 0 : i32
    return %c0_i32, %c0_i32_0 : i32, i32
  }
  func.func @transform_8(%arg0: i32) -> (i32, i32, i32) {
    %c0_i32 = arith.constant 0 : i32
    %c0_i32_0 = arith.constant 0 : i32
    %c0_i32_1 = arith.constant 0 : i32
    return %arg0, %c0_i32, %c0_i32_0 : i32, i32, i32
  }
}

</mosaic_0001>

<bundles_post_ra>
// kernel: tpu_custom_call.1
= control target key start
LH: loop header
LB: loop body
LE: loop exit
PB: predicated region body
PF: predicated region fallthrough
CT: control target
= control target key end

     0   :  { %13 = vsyncpa [#allocation4], 0  ;;  %s1460_s0 = inlined_call_operand.vmem [shape: f32[2,4,362], index: 0, kind: input, shape index: {}]   ;;  %s1461_s1 = inlined_call_operand.vmem [shape: f32[1,324], index: 1, kind: input, shape index: {}]   ;;  %s1462_s2 = inlined_call_operand.vmem [shape: bf16[8,36], index: 2, kind: input, shape index: {}]   ;;  %s1463_s3 = inlined_call_operand.vmem [shape: f32[8,1], index: 3, kind: input, shape index: {}]   ;;  %s1464_s4 = inlined_call_operand.vmem [shape: f32[8,1], index: 4, kind: input, shape index: {}]   ;;  %s1465_s5 = inlined_call_operand.vmem [shape: bf16[8,72], index: 5, kind: input, shape index: {}]   ;;  %s1466_s6 = inlined_call_operand.vmem [shape: f32[8,1], index: 6, kind: input, shape index: {}]   ;;  %s1467_s7 = inlined_call_operand.vmem [shape: f32[8,1], index: 7, kind: input, shape index: {}]   ;;  %s1468_s8 = inlined_call_operand.hbm [shape: f32[2,8,324], index: 8, kind: output, shape index: {}]  }
   0x1   :  { %15 = vsyncpa [#allocation4 + $0x1], 0  ;;  %s1198_s27 = smov 0   ;;  %s1200_s28 = smov 0  }
   0x2   :  { %s1202_s29 = smov 0   ;;  %s1204_s30 = smov 0  }
   0x3 LB: > { %s1219_s9 = sadd.s32 4294967295, %s1138_s30   ;;  %s891_s10 = sadd.s32 4294967294, %s1138_s30   ;;  %s1138_s30 = sphi %s1204_s30, %s1474_s30   ;;  %s1134_s29 = sphi %s1202_s29, %s1473_s29   ;;  %s1130_s28 = sphi %s1200_s28, %s1472_s28   ;;  %s1126_s27 = sphi %s1198_s27, %s1471_s27  }
   0x4   : > { %s1223_s11 = sadd.s32 1, %s1138_s30   ;;  %s201_s12 = sadd.s32 1, %s1134_s29 }
   0x5   : > { %s198_s13 = ssub.s32 %s1138_s30, %s1223_s11  ;;  %p211_p0 = scmp.ne.s32.totalorder %s1134_s29, %s1130_s28 }
   0x6   : > { %p199_p1 = scmp.eq.s32.totalorder %s198_s13, 0  ;;  %p212_p2 = scmp.eq.s32.totalorder %s1219_s9, 1 }
   0x7   : > { %p217_p3 = scmp.ne.s32.totalorder %s1130_s28, %s1126_s27  ;;  %p218_p4 = scmp.eq.s32.totalorder %s891_s10, 1 }
   0x8   : > { %s1234_s14 = scalar_select %p199_p1, %s1134_s29, %s201_s12  }
   0x9   : > { %p1236_p5 = por %p212_p2, %p211_p0  ;;  %p1240_p6 = por %p218_p4, %p217_p3 }
   0xa   : > { %p894_p7 = scmp.ge.s32.totalorder %s1138_s30, 1  ;;  %p265_p8 = scmp.lt.s32.totalorder %s1138_s30, 3 }
   0xc   : > { %p266_p9 = pnand %p894_p7, %p265_p8 }
   0xd   : > { %p299_p10 = scmp.lt.s32.totalorder (!%p266_p9), %s1219_s9, 1  ;;  %s1141_s22 = smov (!%p266_p9), 90  }
   0xe   : > { %269 = sbr.rel (%p266_p9) target bundleno = 867 (0x363), region = 52  ;;  %s1142_s23 = smov (!%p266_p9), 109  }
   0xf   : > { %s1143_s24 = smov (!%p266_p9), 108   ;;  %s1144_s25 = smov (!%p266_p9), 92  }
  0x10   : > { %s1145_s26 = smov (!%p266_p9), 91   ;;  %s1146_s10 = smov (!%p266_p9), 127  }
  0x11   : > { %s1147_s12 = smov (!%p266_p9), 126   ;;  %s1148_s13 = smov (!%p266_p9), 110  }
  0x12   : > { %s1151_s20 = smov (!%p266_p9), 19  }
  0x13   : > { %v1140_v0 = vmov 0.0   ;;  %s300_s17 = scalar_select %p299_p10, %s1219_s9, 1  ;;  %v1149_v9 = vmov 0   ;;  %vm1150_vm0 = vmmov 0   ;;  %v528_v10 = vld [vmem:[%s1463_s3] sm:$0xff]  ;;  %vm437_vm1 = vcmask 1041408  }
  0x14   : > { %915 = vmatprep.subr.bf16.mxu1 %v1140_v0  ;;  %479 = vmatprep.mubr.bf16.mxu0 %v1149_v9  ;;  %v537_v11 = vld [vmem:[%s1464_s4] sm:$0xff]  ;;  %vm404_vm2 = vcmask 736256   ;;  %vm368_vm3 = vcmask 883712   ;;  %vm380_vm4 = vcmask 752640   ;;  %vm392_vm5 = vcmask 744448  }
  0x15   : > { %s940_s18 = smul.u32 12, %s300_s17  ;;  %921 = vmatprep.mubr.msk.bf16.mxu1 %vm1150_vm0, %v1140_v0  ;;  %1033 = vset.pattern.permute.xlu0 %v1149_v9  ;;  %vm356_vm6 = vcmask 891904   ;;  %vm410_vm7 = vcmask 1043456   ;;  %vm320_vm8 = vcmask 1039360   ;;  %vm344_vm9 = vcmask 900096  }
  0x16   : > { %1034 = vset.pattern.permute.xlu1 %v1149_v9  ;;  %vm332_vm10 = vcmask 1031168   ;;  %vm433_vm11 = vcmask 293888   ;;  %vm568_vm12 = vcmask 154624   ;;  %vm570_vm13 = vcmask 868024  }
  0x17   : > { %s303_s21 = scalar_lea.vmem %s1460_s0, %s940_s18  ;;  %569 = vst.msk [vmem:[#allocation2] sm:$0xff] %vm568_vm12, %v1140_v0  ;;  %vm586_vm14 = vcmask 1047704   ;;  %vm589_vm15 = vcmask 711680  }
  0x18   : > { %v1252_v1 = vld [vmem:[%s303_s21 + $0x8] sm:$0xf]  ;;  %v1254_v2 = vld [vmem:[%s303_s21] sm:$0xff]  ;;  %571 = vst.msk [vmem:[#allocation2 + $0x10] sm:$0xff] %vm570_vm13, %v1140_v0  ;;  %s941_s21 = smul.u32 384, %s1219_s9 }
  0x19   : > { %402 = vrot.lane.b32.xlu0 %v1252_v1, %s1141_s22  ;;  %v1260_v3 = vcombine.high %v1254_v2, %v1254_v2  ;;  %v313_v4 = vcombine.low %v1252_v1, %v1252_v1  ;;  %v312_v8 = vcombine.low %v1254_v2, %v1254_v2 }
  0x1b   : > { %v998_v5 = vpack.i.bf16 %v1252_v1, %v1260_v3  ;;  %v993_v6 = vpack.i.bf16 %v1260_v3, %v1254_v2  ;;  %v1003_v7 = vpack.i.bf16 %v313_v4, %v1254_v2 }
  0x1d   : > { %999 = vrot.lane.b32.xlu1 %v998_v5, %s1142_s23  ;;  %994 = vrot.lane.b32.xlu0 %v993_v6, %s1141_s22 }
  0x21   : > { %1004 = vrot.lane.b32.xlu1 %v1003_v7, %s1143_s24  ;;  %1009 = vrot.lane.b32.xlu0 %v998_v5, %s1144_s25 }
  0x25   : > { %1014 = vrot.lane.b32.xlu1 %v1003_v7, %s1145_s26  ;;  %350 = vrot.lane.b32.xlu0 %v1254_v2, %s1142_s23 }
  0x29   : > { %362 = vrot.lane.b32.xlu1 %v312_v8, %s1143_s24  ;;  %374 = vrot.lane.b32.xlu0 %v1254_v2, %s1144_s25 }
  0x2d   : > { %386 = vrot.lane.b32.xlu1 %v312_v8, %s1145_s26  ;;  %1019 = vrot.lane.b32.xlu0 %v1003_v7, %s1146_s10 }
  0x31   : > { %1024 = vrot.lane.b32.xlu1 %v998_v5, %s1147_s12  ;;  %1029 = vrot.lane.b32.xlu0 %v1003_v7, %s1148_s13 }
  0x35   : > { %314 = vrot.lane.b32.xlu1 %v312_v8, %s1146_s10  ;;  %326 = vrot.lane.b32.xlu0 %v1254_v2, %s1147_s12 }
  0x39   : > { %338 = vrot.lane.b32.xlu1 %v312_v8, %s1148_s13  ;;  %531 = vperm.xlu0 %1033, %v528_v10  }
  0x3d   : > { %540 = vperm.xlu1 %1034, %v537_v11  }
  0x8b   : > { %v403_v12 = vpop.permute.xlu0 %402 }
  0x8c   : > { %v432_v13 = vpack.c.bf16 %v403_v12, %v403_v12 }
  0x8e   : > { %v445_v14 = vsel %vm437_vm1, %v432_v13, 0 }
  0x8f   : > { %v1000_v15 = vpop.permute.xlu1 %999  ;;  %v995_v16 = vpop.permute.xlu0 %994  ;;  %916 = vmatpush3.bf16.msra.mxu1 %v445_v14 }
  0x90   : > { %v997_v17 = vunpack.i.h.bf16 %v995_v16  ;;  %v996_v18 = vunpack.i.l.bf16 %v995_v16  ;;  %917 = vmatprep.subr.bf16.mxu1 %v1140_v0  ;;  %v1002_v30 = vunpack.i.h.bf16 %v1000_v15  ;;  %v1001_v31 = vunpack.i.l.bf16 %v1000_v15  ;;  %v423_v16 = vld [vmem:[%s1462_s2] sm:$0xf] }
  0x92   : > { %v406_v19 = vsel %vm404_vm2, %v997_v17, %v403_v12  ;;  %v405_v20 = vsel %vm404_vm2, %v996_v18, %v997_v17  ;;  %v358_v41 = vsel %vm356_vm6, %v1001_v31, %v1002_v30 }
  0x93   : > { %v1005_v21 = vpop.permute.xlu1 %1004  ;;  %v1010_v22 = vpop.permute.xlu0 %1009  ;;  %v431_v23 = vpack.c.bf16 %v406_v19, %v406_v19  ;;  %v430_v24 = vpack.c.bf16 %v405_v20, %v405_v20 }
  0x94   : > { %v1007_v25 = vunpack.i.h.bf16 %v1005_v21  ;;  %v1006_v26 = vunpack.i.l.bf16 %v1005_v21  ;;  %v1012_v27 = vunpack.i.h.bf16 %v1010_v22  ;;  %v1011_v28 = vunpack.i.l.bf16 %v1010_v22 }
  0x95   : > { %896 = vmatprep.subr.msk.bf16.mxu0 %vm437_vm1, %v431_v23  ;;  %v439_v29 = vsel %vm437_vm1, %v430_v24, 0  ;;  %v550_v23 = vlaneseq  ;;  %vm815_vm1 = vcmask 556032  }
  0x96   : > { %458 = vmatpush1.bf16.msra.mxu0 %v439_v29  ;;  %v370_v36 = vsel %vm368_vm3, %v1006_v26, %v1007_v25  ;;  %v382_v37 = vsel %vm380_vm4, %v1011_v28, %v1012_v27  ;;  %v419_v39 = vsel %vm410_vm7, %v1002_v30, %v1007_v25 }
  0x97   : > { %v1015_v32 = vpop.permute.xlu1 %1014  ;;  %v351_v33 = vpop.permute.xlu0 %350  ;;  %v418_v45 = vsel %vm410_vm7, %v358_v41, %v370_v36 }
  0x98   : > { %v1017_v34 = vunpack.i.h.bf16 %v1015_v32  ;;  %v1016_v35 = vunpack.i.l.bf16 %v1015_v32  ;;  %v357_v49 = vsel %vm356_vm6, %v351_v33, %v1001_v31 }
  0x9a   : > { %v394_v38 = vsel %vm392_vm5, %v1016_v35, %v1017_v34  ;;  %v422_v40 = vsel %vm410_vm7, %v1012_v27, %v1017_v34 }
  0x9b   : > { %v363_v42 = vpop.permute.xlu1 %362  ;;  %v375_v43 = vpop.permute.xlu0 %374  ;;  %v429_v44 = vpack.c.bf16 %v422_v40, %v419_v39  ;;  %v421_v46 = vsel %vm410_vm7, %v382_v37, %v394_v38 }
  0x9c   : > { %v428_v47 = vpack.c.bf16 %v421_v46, %v418_v45  ;;  %v369_v48 = vsel %vm368_vm3, %v363_v42, %v1006_v26  ;;  %v381_v52 = vsel %vm380_vm4, %v375_v43, %v1011_v28  ;;  %v551_v26 = vshrl.u32 %v550_v23, 7 }
  0x9d   : > { %918 = vmatpush3.bf16.msra.mxu1 %v429_v44  ;;  %v417_v56 = vsel %vm410_vm7, %v357_v49, %v369_v48 }
  0x9e   : > { %459 = vmatprep.subr.bf16.mxu0 %v428_v47  ;;  %919 = vmatprep.subr.bf16.mxu1 %v1140_v0  ;;  %v552_v29 = vsub.s32 0, %v551_v26  ;;  %v556_v34 = vsub.s32 1, %v551_v26  ;;  %v560_v36 = vsub.s32 2, %v551_v26 }
  0x9f   : > { %v387_v50 = vpop.permute.xlu1 %386  ;;  %v1020_v51 = vpop.permute.xlu0 %1019 }
  0xa0   : > { %v393_v53 = vsel %vm392_vm5, %v387_v50, %v1016_v35  ;;  %v1022_v54 = vunpack.i.h.bf16 %v1020_v51  ;;  %v1021_v55 = vunpack.i.l.bf16 %v1020_v51 }
  0xa1   : > { %v420_v57 = vsel %vm410_vm7, %v381_v52, %v393_v53 }
  0xa2   : > { %v427_v58 = vpack.c.bf16 %v420_v57, %v417_v56  ;;  %v322_v59 = vsel %vm320_vm8, %v1021_v55, %v1022_v54  ;;  %v413_v62 = vsel %vm410_vm7, %v1252_v1, %v1022_v54 }
  0xa3   : > { %v1025_v60 = vpop.permute.xlu1 %1024  ;;  %v1030_v61 = vpop.permute.xlu0 %1029  ;;  %v412_v7 = vsel %vm410_vm7, %v1260_v3, %v322_v59 }
  0xa4   : > { %v1027_v63 = vunpack.i.h.bf16 %v1025_v60  ;;  %v1026_v4 = vunpack.i.l.bf16 %v1025_v60  ;;  %v1032_v5 = vunpack.i.h.bf16 %v1030_v61  ;;  %v1031_v6 = vunpack.i.l.bf16 %v1030_v61  ;;  %460 = vmatpush1.bf16.msra.mxu0 %v427_v58  ;;  %v804_v61 = vld [vmem:[%s1467_s7] sm:$0xff] }
  0xa6   : > { %v346_v8 = vsel %vm344_vm9, %v1031_v6, %v1032_v5  ;;  %v416_v10 = vsel %vm410_vm7, %v1027_v63, %v1032_v5  ;;  %v334_v11 = vsel %vm332_vm10, %v1026_v4, %v1027_v63 }
  0xa7   : > { %v315_v12 = vpop.permute.xlu1 %314  ;;  %v426_v13 = vpack.c.bf16 %v416_v10, %v413_v62  ;;  %v415_v14 = vsel %vm410_vm7, %v334_v11, %v346_v8  ;;  %v327_v1 = vpop.permute.xlu0 %326  ;;  %v795_v62 = vld [vmem:[%s1466_s6] sm:$0xff] }
  0xa8   : > { %v425_v15 = vpack.c.bf16 %v415_v14, %v412_v7  ;;  %v321_v3 = vsel %vm320_vm8, %v315_v12, %v1021_v55  ;;  %v333_v18 = vsel %vm332_vm10, %v327_v1, %v1026_v4 }
  0xa9   : > { %920 = vmatpush3.bf16.msra.mxu1 %v426_v13  ;;  %v411_v20 = vsel %vm410_vm7, %v1254_v2, %v321_v3 }
  0xaa   : > { %461 = vmatprep.subr.bf16.mxu0 %v425_v15  ;;  %925 = vmatprep.subr.bf16.mxu1 %v1140_v0 }
  0xab   : > { %v339_v17 = vpop.permute.xlu1 %338 }
  0xac   : > { %v345_v19 = vsel %vm344_vm9, %v339_v17, %v1031_v6  ;;  %922 = vmatmul.mubr.msk.bf16.vlgmr.msra.gmra.mxu1 %vm433_vm11, %v423_v16 }
  0xad   : > { %v414_v21 = vsel %vm410_vm7, %v333_v18, %v345_v19  ;;  %935 = vmatprep.mubr.msk.bf16.mxu1 %vm1150_vm0, %v1140_v0  ;;  %vm701_vm0 = vcmask 588800  }
  0xae   : > { %v424_v22 = vpack.c.bf16 %v414_v21, %v411_v20 }
  0xb0   : > { %462 = vmatpush1.bf16.msra.mxu0 %v424_v22 }
  0xb3   : > { %897 = vmatmul.mubr.msk.bf16.vlgmr.msra.gmra.mxu0 %vm433_vm11, %v423_v16 }
  0xb4   : > { %746 = vmatprep.mubr.bf16.mxu0 %v1149_v9  ;;  %v532_v27 = vpop.permute.xlu0 %531  ;;  %v305_v9 = vld [vmem:[%s1461_s1] sm:$0x7] }
  0xb5   : > { %v553_v40 = vrot.slane %v305_v9, %v552_v29  ;;  %v557_v44 = vrot.slane %v305_v9, %v556_v34  ;;  %v561_v49 = vrot.slane %v305_v9, %v560_v36 }
  0xb8   : > { %v541_v32 = vpop.permute.xlu1 %540 }
 0x16c   : > { %v522_v24 = vpop.f32.mrf.mxu1 }
 0x16d   : > { %v536_v28 = vmul.f32 %v532_v27, %v522_v24 }
 0x16e   : > { %v923_v25 = vpop.f32.mrf.mxu1 }
 0x16f   : > { %v545_v38 = vadd.f32 %v541_v32, %v536_v28 }
 0x170   : > { %v525_v2 = vpop.f32.mrf.mxu1 }
 0x171   : > { %v548_v46 = vmax.f32 %v545_v38, 0.0 }
 0x172   : > { %v924_v30 = vpop.f32.mrf.mxu1 }
 0x173   : > { %v481_v31 = vpop.f32.mrf.mxu0  ;;  %v567_v51 = vmul.f32 %v561_v49, %v548_v46 }
 0x174   : > { %v534_v33 = vmul.f32 %v532_v27, %v481_v31 }
 0x175   : > { %v483_v35 = vpop.f32.mrf.mxu0 }
 0x176   : > { %v543_v37 = vadd.f32 %v541_v32, %v534_v33  ;;  %v535_v39 = vmul.f32 %v532_v27, %v483_v35 }
 0x177   : > { %v485_v41 = vpop.f32.mrf.mxu0 }
 0x178   : > { %v546_v42 = vmax.f32 %v543_v37, 0.0  ;;  %v544_v43 = vadd.f32 %v541_v32, %v535_v39 }
 0x179   : > { %v486_v45 = vpop.f32.mrf.mxu0 }
 0x17a   : > { %v547_v47 = vmax.f32 %v544_v43, 0.0  ;;  %v565_v48 = vmul.f32 %v553_v40, %v546_v42 }
 0x17c   : > { %575 = vrot.lane.b32.xlu1 %v565_v48, %s1151_s20  ;;  %v566_v50 = vmul.f32 %v557_v44, %v547_v47 }
 0x17e   : > { %577 = vrot.lane.b32.xlu0 %v566_v50, %s1151_s20 }
 0x180   : > { %579 = vrot.lane.b32.xlu1 %v567_v51, %s1151_s20 }
 0x1ee   : > { %v576_v52 = vpop.permute.xlu1 %575 }
 0x1ef   : > { %587 = vst.msk [vmem:[#allocation2] sm:$0xff] %vm586_vm14, %v576_v52 }
 0x1f0   : > { %v578_v53 = vpop.permute.xlu0 %577 }
 0x1f1   : > { %v1350_v54 = vsel %vm568_vm12, %v576_v52, %v578_v53 }
 0x1f2   : > { %v580_v55 = vpop.permute.xlu1 %579 }
 0x1f3   : > { %v582_v56 = vsel %vm568_vm12, %v578_v53, %v580_v55 }
 0x1f4   : > { %590 = vst.msk [vmem:[#allocation2 + $0x10] sm:$0xff] %vm589_vm15, %v582_v56 }
 0x1f6   : > { %v1353_v57 = vld [vmem:[#allocation2] sm:$0xff] }
 0x1f7   : > { %663 = vrot.lane.b32.xlu1 %v1353_v57, %s1145_s26  ;;  %652 = vrot.lane.b32.xlu0 %v1353_v57, %s1144_s25  ;;  %v1035_v60 = vpack.i.bf16 %v1350_v54, %v1353_v57 }
 0x1fb   : > { %641 = vrot.lane.b32.xlu1 %v1353_v57, %s1143_s24  ;;  %630 = vrot.lane.b32.xlu0 %v1353_v57, %s1142_s23  ;;  %v1363_v58 = vld [vmem:[#allocation2 + $0x10] sm:$0xff] }
 0x1fc   : > { %v1045_v59 = vpack.i.bf16 %v1363_v58, %v1350_v54 }
 0x1ff   : > { %608 = vrot.lane.b32.xlu0 %v1353_v57, %s1147_s12  ;;  %678 = vrot.lane.b32.xlu1 %v1363_v58, %s1141_s22 }
 0x203   : > { %1046 = vrot.lane.b32.xlu1 %v1045_v59, %s1145_s26  ;;  %1036 = vrot.lane.b32.xlu0 %v1035_v60, %s1141_s22  ;;  %s1425_s26 = scalar_lea.hbm %s1468_s8, %s941_s21 }
 0x207   : > { %1056 = vrot.lane.b32.xlu1 %v1045_v59, %s1143_s24  ;;  %1041 = vrot.lane.b32.xlu0 %v1045_v59, %s1144_s25  ;;  %s1152_s24 = smov [#allocation3]  }
 0x208   : > { %s1082_s25 = sshll.u32 %s1152_s24, 4  ;;  %s1083_s25 = int_to_ptr.vmem [resolvable:$false] %s1082_s25 }
 0x20b   : > { %1066 = vrot.lane.b32.xlu1 %v1045_v59, %s1148_s13  ;;  %1051 = vrot.lane.b32.xlu0 %v1045_v59, %s1142_s23  ;;  %s1084_s23 = scalar_lea.vmem %s1083_s25, 768 }
 0x20f   : > { %619 = vrot.lane.b32.xlu1 %v1353_v57, %s1148_s13  ;;  %1061 = vrot.lane.b32.xlu0 %v1045_v59, %s1147_s12  ;;  %s296_s12 = sand.u32 1, %s1130_s28  }
 0x210   : > { %s939_s13 = smul.u32 24, %s296_s12  ;;  %s818_s9 = scalar_lea.sflag [#allocation4], %s296_s12 }
 0x212   : > { %s298_s17 = scalar_lea.vmem [#allocation3], %s939_s13 }
 0x213   : > { %597 = vrot.lane.b32.xlu1 %v1353_v57, %s1146_s10  ;;  %1071 = vrot.lane.b32.xlu0 %v1045_v59, %s1146_s10  ;;  %s832_s18 = sshll.u32 %s298_s17, 4  ;;  %s833_s18 = int_to_ptr.vmem [resolvable:$true] %s832_s18 }
 0x214   : > { %s1078_s22 = scalar_lea.vmem %s833_s18, 384  ;;  %p1085_p0 = scmp.lt.s32.totalorder %s833_s18, %s1083_s25 }
 0x215   : > { %p1079_p11 = scmp.ne.s32.totalorder %s833_s18, %s1078_s22  ;;  %p1086_p1 = scmp.lt.s32.totalorder %s1084_s23, %s1078_s22 }
 0x217   : > { %807 = vperm.xlu1 %1034, %v804_v61   ;;  %798 = vperm.xlu0 %1033, %v795_v62   ;;  %p1080_p12 = pnand %p1079_p11, %p1236_p5  ;;  %p1087_p2 = por %p1086_p1, %p1085_p0 }
 0x219   : > { %p1081_p13 = pneg %p1080_p12 }
 0x21b   : > { %p1088_p3 = pnand %p1087_p2, %p1081_p13 }
 0x269   : > { %v664_v63 = vpop.permute.xlu1 %663  ;;  %v653_v4 = vpop.permute.xlu0 %652 }
 0x26d   : > { %v642_v5 = vpop.permute.xlu1 %641  ;;  %v631_v6 = vpop.permute.xlu0 %630 }
 0x271   : > { %v679_v7 = vpop.permute.xlu1 %678  ;;  %v609_v8 = vpop.permute.xlu0 %608 }
 0x272   : > { %v700_v10 = vpack.c.bf16 %v679_v7, %v679_v7 }
 0x274   : > { %v712_v11 = vsel %vm410_vm7, %v700_v10, 0 }
 0x275   : > { %926 = vmatpush3.bf16.msra.mxu1 %v712_v11  ;;  %v1047_v12 = vpop.permute.xlu1 %1046  ;;  %v1037_v13 = vpop.permute.xlu0 %1036 }
 0x276   : > { %v1039_v14 = vunpack.i.h.bf16 %v1037_v13  ;;  %v1038_v15 = vunpack.i.l.bf16 %v1037_v13  ;;  %927 = vmatprep.subr.bf16.mxu1 %v1140_v0  ;;  %v1049_v1 = vunpack.i.h.bf16 %v1047_v12  ;;  %v1048_v16 = vunpack.i.l.bf16 %v1047_v12 }
 0x278   : > { %v681_v3 = vsel %vm404_vm2, %v1039_v14, %v679_v7  ;;  %v680_v17 = vsel %vm404_vm2, %v1038_v15, %v1039_v14  ;;  %v669_v24 = vsel %vm392_vm5, %v664_v63, %v1048_v16  ;;  %v670_v27 = vsel %vm392_vm5, %v1048_v16, %v1049_v1 }
 0x279   : > { %v699_v18 = vpack.c.bf16 %v681_v3, %v681_v3  ;;  %v1057_v19 = vpop.permute.xlu1 %1056  ;;  %v1042_v20 = vpop.permute.xlu0 %1041  ;;  %v698_v21 = vpack.c.bf16 %v680_v17, %v680_v17 }
 0x27a   : > { %v1044_v22 = vunpack.i.h.bf16 %v1042_v20  ;;  %v1043_v23 = vunpack.i.l.bf16 %v1042_v20  ;;  %v1058_v25 = vunpack.i.l.bf16 %v1057_v19  ;;  %v1059_v2 = vunpack.i.h.bf16 %v1057_v19 }
 0x27b   : > { %899 = vmatprep.subr.msk.bf16.mxu0 %vm410_vm7, %v699_v18  ;;  %v706_v26 = vsel %vm410_vm7, %v698_v21, 0 }
 0x27c   : > { %v697_v28 = vpack.c.bf16 %v1049_v1, %v1044_v22  ;;  %v658_v29 = vsel %vm380_vm4, %v653_v4, %v1043_v23  ;;  %721 = vmatpush1.bf16.msra.mxu0 %v706_v26  ;;  %v659_v30 = vsel %vm380_vm4, %v1043_v23, %v1044_v22  ;;  %v647_v36 = vsel %vm368_vm3, %v642_v5, %v1058_v25 }
 0x27d   : > { %v695_v31 = vpack.c.bf16 %v669_v24, %v658_v29  ;;  %v1067_v32 = vpop.permute.xlu1 %1066  ;;  %v1052_v9 = vpop.permute.xlu0 %1051  ;;  %v696_v33 = vpack.c.bf16 %v670_v27, %v659_v30  ;;  %v648_v42 = vsel %vm368_vm3, %v1058_v25, %v1059_v2 }
 0x27e   : > { %v1054_v34 = vunpack.i.h.bf16 %v1052_v9  ;;  %v1053_v35 = vunpack.i.l.bf16 %v1052_v9  ;;  %928 = vmatpush3.bf16.msra.mxu1 %v697_v28  ;;  %v1069_v37 = vunpack.i.h.bf16 %v1067_v32  ;;  %v1068_v38 = vunpack.i.l.bf16 %v1067_v32 }
 0x27f   : > { %722 = vmatprep.subr.bf16.mxu0 %v696_v33  ;;  %929 = vmatprep.subr.bf16.mxu1 %v1140_v0 }
 0x280   : > { %v694_v39 = vpack.c.bf16 %v1059_v2, %v1054_v34  ;;  %v636_v40 = vsel %vm356_vm6, %v631_v6, %v1053_v35  ;;  %723 = vmatpush1.bf16.msra.mxu0 %v695_v31  ;;  %v637_v41 = vsel %vm356_vm6, %v1053_v35, %v1054_v34  ;;  %v626_v49 = vsel %vm344_vm9, %v1068_v38, %v1069_v37 }
 0x281   : > { %v692_v43 = vpack.c.bf16 %v647_v36, %v636_v40  ;;  %v620_v44 = vpop.permute.xlu1 %619  ;;  %v1062_v45 = vpop.permute.xlu0 %1061  ;;  %v693_v46 = vpack.c.bf16 %v648_v42, %v637_v41 }
 0x282   : > { %v1064_v47 = vunpack.i.h.bf16 %v1062_v45  ;;  %v1063_v48 = vunpack.i.l.bf16 %v1062_v45  ;;  %930 = vmatpush3.bf16.msra.mxu1 %v694_v39  ;;  %v625_v50 = vsel %vm344_vm9, %v620_v44, %v1068_v38 }
 0x283   : > { %724 = vmatprep.subr.bf16.mxu0 %v693_v46  ;;  %931 = vmatprep.subr.bf16.mxu1 %v1140_v0 }
 0x284   : > { %v691_v51 = vpack.c.bf16 %v1069_v37, %v1064_v47  ;;  %v614_v52 = vsel %vm332_vm10, %v609_v8, %v1063_v48  ;;  %725 = vmatpush1.bf16.msra.mxu0 %v692_v43  ;;  %v615_v53 = vsel %vm332_vm10, %v1063_v48, %v1064_v47  ;;  %v685_v8 = vld [vmem:[%s1465_s5] sm:$0xf] }
 0x285   : > { %v689_v55 = vpack.c.bf16 %v625_v50, %v614_v52  ;;  %v1072_v56 = vpop.permute.xlu0 %1071  ;;  %v690_v59 = vpack.c.bf16 %v626_v49, %v615_v53  ;;  %v598_v62 = vpop.permute.xlu1 %597 }
 0x286   : > { %v1074_v60 = vunpack.i.h.bf16 %v1072_v56  ;;  %v1073_v61 = vunpack.i.l.bf16 %v1072_v56  ;;  %932 = vmatpush3.bf16.msra.mxu1 %v691_v51 }
 0x287   : > { %726 = vmatprep.subr.bf16.mxu0 %v690_v59  ;;  %933 = vmatprep.subr.bf16.mxu1 %v1140_v0 }
 0x288   : > { %v688_v63 = vpack.c.bf16 %v1074_v60, %v1363_v58  ;;  %v603_v4 = vsel %vm320_vm8, %v598_v62, %v1073_v61  ;;  %727 = vmatpush1.bf16.msra.mxu0 %v689_v55  ;;  %v604_v5 = vsel %vm320_vm8, %v1073_v61, %v1074_v60 }
 0x289   : > { %v686_v6 = vpack.c.bf16 %v603_v4, %v1353_v57  ;;  %v687_v7 = vpack.c.bf16 %v604_v5, %v1350_v54 }
 0x28a   : > { %934 = vmatpush3.bf16.msra.mxu1 %v688_v63 }
 0x28b   : > { %728 = vmatprep.subr.bf16.mxu0 %v687_v7 }
 0x28c   : > { %729 = vmatpush1.bf16.msra.mxu0 %v686_v6 }
 0x28d   : > { %936 = vmatmul.mubr.msk.bf16.vlgmr.msra.gmra.mxu1 %vm701_vm0, %v685_v8 }
 0x28f   : > { %900 = vmatmul.mubr.msk.bf16.vlgmr.msra.gmra.mxu0 %vm701_vm0, %v685_v8 }
 0x292   : > { %v799_v0 = vpop.permute.xlu0 %798  ;;  %v808_v10 = vpop.permute.xlu1 %807 }
 0x34d   : > { %v789_v58 = vpop.f32.mrf.mxu1 }
 0x34e   : > { %v803_v11 = vmul.f32 %v799_v0, %v789_v58 }
 0x34f   : > { %v748_v57 = vpop.f32.mrf.mxu0  ;;  %v937_v54 = vpop.f32.mrf.mxu1 }
 0x350   : > { %v812_v12 = vadd.f32 %v808_v10, %v803_v11  ;;  %v801_v13 = vmul.f32 %v799_v0, %v748_v57 }
 0x351   : > { %v750_v14 = vpop.f32.mrf.mxu0  ;;  %v792_v15 = vpop.f32.mrf.mxu1 }
 0x352   : > { %816 = vst.msk [vmem:[%s298_s17 + $0x10] sm:$0xff] %vm815_vm1, %v812_v12  ;;  %v810_v1 = vadd.f32 %v808_v10, %v801_v13  ;;  %v802_v16 = vmul.f32 %v799_v0, %v750_v14 }
 0x353   : > { %v752_v3 = vpop.f32.mrf.mxu0  ;;  %v938_v17 = vpop.f32.mrf.mxu1 }
 0x354   : > { %813 = vst [vmem:[%s298_s17] sm:$0xff] %v810_v1  ;;  %v811_v18 = vadd.f32 %v808_v10, %v802_v16 }
 0x355   : > { %v753_v19 = vpop.f32.mrf.mxu0 }
 0x356   : > { %814 = vst [vmem:[%s298_s17 + $0x8] sm:$0xff] %v811_v18 }
 0x357   : > { %1091 = shalt.err (!%p1088_p3)
}
 0x358   : > { %s1092_s10 = scalar_lea.hbm %s1425_s26, 384  ;;  %s1096_s21 = scalar_lea.hbm %s1468_s8, 768 }
 0x359   : > { %p1093_p4 = scmp.ne.s32.totalorder %s1425_s26, %s1092_s10  ;;  %p1097_p9 = scmp.lt.s32.totalorder %s1425_s26, %s1468_s8 }
 0x35a   : > { %p1098_p10 = scmp.lt.s32.totalorder %s1096_s21, %s1092_s10 }
 0x35b   : > { %p1094_p7 = pnand %p1093_p4, %p1236_p5 }
 0x35c   : > { %p1099_p11 = por %p1098_p10, %p1097_p9 }
 0x35d   : > { %p1095_p8 = pneg %p1094_p7 }
 0x35f   : > { %p1100_p12 = pnand %p1099_p11, %p1095_p8 }
 0x361   : > { %1103 = shalt.err (!%p1100_p12)
}
 0x362   : > { %942 = dma.vmem_to_hbm [thread:$0]  (%p1236_p5), %s833_s18, 384, %s1425_s26, %s818_s9  }
 0x363 PF: > { %p948_p13 = scmp.ge.s32.totalorder %s1138_s30, 2  ;;  %s844_s20 = sand.u32 1, %s1126_s27  }
 0x364   : > { %s845_s22 = scalar_lea.sflag [#allocation4], %s844_s20 }
 0x365   : > { %p945_p0 = pnand %p948_p13, %p1240_p6 }
 0x367   : > { %p946_p1 = pneg %p945_p0 }
 0x369   : > { %1121 = dma.done.wait (%p946_p1), %s845_s22, 384  }
 0x36a   : > { %1123 = vsyncadd (%p946_p1), %s845_s22, 4294966912  ;;  %p18_p2 = scmp.ge.s32.totalorder %s1223_s11, 4   ;;  %s1471_s27 = smov %s1130_s28 }
 0x36b   : > { %s1472_s28 = smov %s1134_s29  ;;  %s1473_s29 = smov %s1234_s14 }
 0x36c   : > { %s1474_s30 = smov %s1223_s11  ;;  %20 = sbr.rel (!%p18_p2) target bundleno = 3 (0x3), region = 87 }
 0x371   :  { %850 = vsyncpa [#allocation4], 1 }
 0x372   :  { %852 = vsyncpa [#allocation4 + $0x1], 1 }

</bundles_post_ra>
